<compile_context>
chip_gen: v7x
topology: tpu7x:2x2x1
jax: 0.10.0
libtpu: 0.0.40
codegen_flags: <defaults>
</compile_context>

<pallas_src>
import functools

import jax
import jax.numpy as jnp
from jax.experimental import pallas as pl
from jax.experimental.pallas import tpu as pltpu

_VMEM = pl.BlockSpec(memory_space=pltpu.MemorySpace.VMEM)


def _round_up(n, m):
    return ((n + m - 1) // m) * m


# ----------------------------------------------------------------------------
# Fused Pallas kernel
# ----------------------------------------------------------------------------
def _fused_forward_kernel(x_ref, h0_ref, c0_ref, *refs,
                          num_lstm_layers, num_fc_layers, hidden):
    """Fused single-step LSTM stack + FC head.

    refs layout (inputs then outputs):
      [w_cat_t_0, b_0, ..., w_cat_t_{L-1}, b_{L-1},      # LSTM params
       fc_w_t_0, fc_b_0, ..., fc_w_t_{F-1}, fc_b_{F-1},  # FC params
       out_ref, hc_ref]                                  # outputs
    """
    H = hidden
    L = num_lstm_layers
    F = num_fc_layers
    lstm_refs = refs[:2 * L]
    fc_refs = refs[2 * L:2 * L + 2 * F]
    out_ref, hc_ref = refs[2 * L + 2 * F:]

    layer_in = x_ref[...]                      # (B_pad, input_dim)
    h_new, c_new = [], []
    for l in range(L):
        w_ref = lstm_refs[2 * l]               # (in_dim_l + H, 4H), pre-stacked [W_ih_t; W_hh_t]
        b_ref = lstm_refs[2 * l + 1]           # (1, 4H), b_ih + b_hh
        h_prev = h0_ref[l]                     # (B_pad, H)
        c_prev = c0_ref[l]                     # (B_pad, H)

        # One merged matmul per cell: [x | h] @ [W_ih_t ; W_hh_t] + b
        xh = jnp.concatenate([layer_in, h_prev], axis=1)
        gates = (jnp.dot(xh, w_ref[...], preferred_element_type=jnp.float32)
                 + b_ref[...])

        # Transcendentals on the full 4H-lane gate vector (EUP slot), slice after.
        sig = jax.nn.sigmoid(gates)
        th = jnp.tanh(gates)
        i = sig[:, 0 * H:1 * H]
        f = sig[:, 1 * H:2 * H]
        g = th[:, 2 * H:3 * H]
        o = sig[:, 3 * H:4 * H]

        c_l = f * c_prev + i * g
        h_l = o * jnp.tanh(c_l)
        h_new.append(h_l)
        c_new.append(c_l)
        layer_in = h_l                         # output of layer l feeds layer l+1

    # Single lane-dense store of all new state:
    #   [h_0 | ... | h_{L-1} | c_0 | ... | c_{L-1}]  -> (B_pad, 2*L*H)
    hc_ref[...] = jnp.concatenate(h_new + c_new, axis=1)

    # FC head: (F-1) x [Linear(H,H), ReLU] + Linear(H, out_pad) (final weight lane-padded).
    out = layer_in
    for fi in range(F):
        w_ref = fc_refs[2 * fi]
        b_ref = fc_refs[2 * fi + 1]
        out = (jnp.dot(out, w_ref[...], preferred_element_type=jnp.float32)
               + b_ref[...])
        if fi < F - 1:
            out = jnp.maximum(out, 0.0)        # non_linear_type == 'ReLU'
    # TODO(synk): PReLU variant (learned negative slope) not implemented; this instance uses ReLU.
    out_ref[...] = out


# ----------------------------------------------------------------------------
# Parameter init (kernel-packed + raw PyTorch-shaped copies for the reference)
# ----------------------------------------------------------------------------
def init_params(key, input_dim, hidden, output_dim, num_lstm_layers, num_fc_layers):
    scale = 1.0 / jnp.sqrt(jnp.float32(hidden))
    params = {"lstm": [], "fc": [], "output_dim": output_dim}
    raw = {"lstm": [], "fc": []}

    for layer in range(num_lstm_layers):
        in_dim = input_dim if layer == 0 else hidden
        key, k1, k2, k3, k4 = jax.random.split(key, 5)
        w_ih = jax.random.uniform(k1, (4 * hidden, in_dim), jnp.float32, -scale, scale)
        w_hh = jax.random.uniform(k2, (4 * hidden, hidden), jnp.float32, -scale, scale)
        b_ih = jax.random.uniform(k3, (4 * hidden,), jnp.float32, -scale, scale)
        b_hh = jax.random.uniform(k4, (4 * hidden,), jnp.float32, -scale, scale)
        # Pre-stack [W_ih_t ; W_hh_t] -> (in_dim + H, 4H): one dot per cell in-kernel.
        w_cat_t = jnp.concatenate([w_ih.T, w_hh.T], axis=0)
        params["lstm"].append({"w_cat_t": w_cat_t,
                               "b": (b_ih + b_hh).reshape(1, 4 * hidden)})
        raw["lstm"].append({"w_ih": w_ih, "w_hh": w_hh, "b_ih": b_ih, "b_hh": b_hh})

    out_pad = max(128, _round_up(output_dim, 128))   # lane-dense final output slab
    for i in range(num_fc_layers):
        last = (i == num_fc_layers - 1)
        out_f = output_dim if last else hidden
        key, k1, k2 = jax.random.split(key, 3)
        w = jax.random.uniform(k1, (out_f, hidden), jnp.float32, -scale, scale)
        b = jax.random.uniform(k2, (out_f,), jnp.float32, -scale, scale)
        w_t = w.T
        b_row = b.reshape(1, out_f)
        if last and out_f < out_pad:
            # Pad final layer to >=128 output lanes; wrapper slices back to output_dim.
            w_t = jnp.pad(w_t, ((0, 0), (0, out_pad - out_f)))
            b_row = jnp.pad(b_row, ((0, 0), (0, out_pad - out_f)))
        params["fc"].append({"w_t": w_t, "b": b_row})
        raw["fc"].append({"w": w, "b": b, "relu": not last})
    return params, raw


# ----------------------------------------------------------------------------
# Model wrapper (single fused pallas_call + layout plumbing)
# ----------------------------------------------------------------------------
def lstm_internal_forward(params, hidden_state, final_lstm_input):
    """Mirrors LSTMInternal.forward:
       out, new_hidden = LSTM(x.unsqueeze(1), (h0, c0)); out = fc(out.squeeze(1))."""
    h0, c0 = hidden_state                    # each (num_layers, B, H)
    x = final_lstm_input                     # (B, input_dim); seq_len == 1 is folded away
    L, B, H = h0.shape
    F = len(params["fc"])
    output_dim = params["output_dim"]
    out_pad = params["fc"][-1]["w_t"].shape[1]

    # Pad batch to the native 8-sublane f32 tile (full-width vld/vst, no row masks).
    B_pad = max(8, _round_up(B, 8))
    x_p = jnp.pad(x, ((0, B_pad - B), (0, 0)))
    h0_p = jnp.pad(h0, ((0, 0), (0, B_pad - B), (0, 0)))
    c0_p = jnp.pad(c0, ((0, 0), (0, B_pad - B), (0, 0)))

    flat = []
    for p in params["lstm"]:
        flat += [p["w_cat_t"], p["b"]]
    for p in params["fc"]:
        flat += [p["w_t"], p["b"]]

    kernel = functools.partial(_fused_forward_kernel,
                               num_lstm_layers=L, num_fc_layers=F, hidden=H)
    out_p, hc = pl.pallas_call(
        kernel,
        out_shape=(jax.ShapeDtypeStruct((B_pad, out_pad), jnp.float32),
                   jax.ShapeDtypeStruct((B_pad, 2 * L * H), jnp.float32)),
        in_specs=[_VMEM] * (3 + len(flat)),
        out_specs=(_VMEM, _VMEM),
    )(x_p, h0_p, c0_p, *flat)

    out = out_p[:B, :output_dim]
    h_new = hc[:B, :L * H].reshape(B, L, H).transpose(1, 0, 2)
    c_new = hc[:B, L * H:2 * L * H].reshape(B, L, H).transpose(1, 0, 2)
    return out, (h_new, c_new)


# ----------------------------------------------------------------------------
# Pure-JAX reference (PyTorch semantics, for correctness check only)
# ----------------------------------------------------------------------------
def _reference_forward(raw, hidden_state, x):
    h0, c0 = hidden_state
    H = h0.shape[-1]
    new_h, new_c = [], []
    layer_in = x
    for layer, p in enumerate(raw["lstm"]):
        gates = (layer_in @ p["w_ih"].T + h0[layer] @ p["w_hh"].T
                 + p["b_ih"] + p["b_hh"])
        i = jax.nn.sigmoid(gates[:, 0 * H:1 * H])
        f = jax.nn.sigmoid(gates[:, 1 * H:2 * H])
        g = jnp.tanh(gates[:, 2 * H:3 * H])
        o = jax.nn.sigmoid(gates[:, 3 * H:4 * H])
        c_new = f * c0[layer] + i * g
        h_new = o * jnp.tanh(c_new)
        new_h.append(h_new)
        new_c.append(c_new)
        layer_in = h_new
    out = layer_in
    for p in raw["fc"]:
        out = out @ p["w"].T + p["b"]
        if p["relu"]:
            out = jnp.maximum(out, 0.0)
    return out, (jnp.stack(new_h, 0), jnp.stack(new_c, 0))


# ----------------------------------------------------------------------------
if __name__ == "__main__":
    # model_architecture_params for this synthetic instance
    input_dim = 16
    output_dim = 8
    number_of_lstm_layers = 2
    internal_latent_space_dim = 32     # hidden
    number_of_fc_layers = 2
    batch_size = 2

    key = jax.random.PRNGKey(0)
    key, k_params, k_x, k_h, k_c = jax.random.split(key, 5)

    params, raw = init_params(k_params, input_dim, internal_latent_space_dim,
                              output_dim, number_of_lstm_layers, number_of_fc_layers)

    final_lstm_input = jax.random.normal(k_x, (batch_size, input_dim), jnp.float32)
    h0 = 0.1 * jax.random.normal(
        k_h, (number_of_lstm_layers, batch_size, internal_latent_space_dim), jnp.float32)
    c0 = 0.1 * jax.random.normal(
        k_c, (number_of_lstm_layers, batch_size, internal_latent_space_dim), jnp.float32)
    hidden_state = (h0, c0)

    out, (h_new, c_new) = lstm_internal_forward(params, hidden_state, final_lstm_input)
    jax.block_until_ready((out, h_new, c_new))

    ref_out, (ref_h, ref_c) = _reference_forward(raw, hidden_state, final_lstm_input)
    assert out.shape == (batch_size, output_dim)
    assert h_new.shape == (number_of_lstm_layers, batch_size, internal_latent_space_dim)
    assert c_new.shape == h_new.shape
    assert jnp.allclose(out, ref_out, atol=1e-5, rtol=1e-5)
    assert jnp.allclose(h_new, ref_h, atol=1e-5, rtol=1e-5)
    assert jnp.allclose(c_new, ref_c, atol=1e-5, rtol=1e-5)

    print("KERNEL_OK")
</pallas_src>

<mosaic_0001>
module attributes {stable_mosaic.version = 11 : i64} {
  func.func @_fused_forward_kernel(%arg0: memref<8x16xf32, #tpu.memory_space<vmem>>, %arg1: memref<2x8x32xf32, #tpu.memory_space<vmem>>, %arg2: memref<2x8x32xf32, #tpu.memory_space<vmem>>, %arg3: memref<48x128xf32, #tpu.memory_space<vmem>>, %arg4: memref<1x128xf32, #tpu.memory_space<vmem>>, %arg5: memref<64x128xf32, #tpu.memory_space<vmem>>, %arg6: memref<1x128xf32, #tpu.memory_space<vmem>>, %arg7: memref<32x32xf32, #tpu.memory_space<vmem>>, %arg8: memref<1x32xf32, #tpu.memory_space<vmem>>, %arg9: memref<32x128xf32, #tpu.memory_space<vmem>>, %arg10: memref<1x128xf32, #tpu.memory_space<vmem>>, %arg11: memref<8x128xf32, #tpu.memory_space<vmem>>, %arg12: memref<8x128xf32, #tpu.memory_space<vmem>>) attributes {dimension_semantics = [], scalar_prefetch = 0 : i64, scratch_operands = 0 : i64, tpu.core_type = #tpu.core_type<tc>} {
    %c0 = arith.constant 0 : index
    %c0_0 = arith.constant 0 : index
    %0 = vector.load %arg0[%c0, %c0_0] : memref<8x16xf32, #tpu.memory_space<vmem>>, vector<8x16xf32>
    %c0_1 = arith.constant 0 : index
    %c0_2 = arith.constant 0 : index
    %c0_3 = arith.constant 0 : index
    %1 = vector.load %arg1[%c0_1, %c0_2, %c0_3] : memref<2x8x32xf32, #tpu.memory_space<vmem>>, vector<1x8x32xf32>
    %2 = vector.shape_cast %1 : vector<1x8x32xf32> to vector<8x32xf32>
    %c0_4 = arith.constant 0 : index
    %c0_5 = arith.constant 0 : index
    %c0_6 = arith.constant 0 : index
    %3 = vector.load %arg2[%c0_4, %c0_5, %c0_6] : memref<2x8x32xf32, #tpu.memory_space<vmem>>, vector<1x8x32xf32>
    %4 = vector.shape_cast %3 : vector<1x8x32xf32> to vector<8x32xf32>
    %5 = tpu.concatenate %0, %2 in 1 : vector<8x16xf32>, vector<8x32xf32> -> vector<8x48xf32>
    %c0_7 = arith.constant 0 : index
    %c0_8 = arith.constant 0 : index
    %6 = vector.load %arg3[%c0_7, %c0_8] : memref<48x128xf32, #tpu.memory_space<vmem>>, vector<48x128xf32>
    %cst = arith.constant dense<0.000000e+00> : vector<8x128xf32>
    %7 = tpu.matmul %5, %6, %cst {dimension_numbers = #tpu.dot_dimension_numbers<[1], [0], [0], [1], [0, 0, 1, 1], [], []>} : vector<8x48xf32>, vector<48x128xf32>, vector<8x128xf32> -> vector<8x128xf32>
    %c0_9 = arith.constant 0 : index
    %c0_10 = arith.constant 0 : index
    %8 = vector.load %arg4[%c0_9, %c0_10] : memref<1x128xf32, #tpu.memory_space<vmem>>, vector<1x128xf32>
    %9 = vector.broadcast %8 : vector<1x128xf32> to vector<8x128xf32>
    %10 = arith.addf %7, %9 : vector<8x128xf32>
    %11 = arith.negf %10 : vector<8x128xf32>
    %12 = math.exp %11 : vector<8x128xf32>
    %cst_11 = arith.constant 1.000000e+00 : f32
    %13 = vector.broadcast %cst_11 : f32 to vector<8x128xf32>
    %14 = arith.addf %13, %12 : vector<8x128xf32>
    %15 = arith.divf %13, %14 : vector<8x128xf32>
    %16 = math.tanh %10 : vector<8x128xf32>
    %17 = vector.extract_strided_slice %15 {offsets = [0, 0], sizes = [8, 32], strides = [1, 1]} : vector<8x128xf32> to vector<8x32xf32>
    %18 = vector.extract_strided_slice %15 {offsets = [0, 32], sizes = [8, 32], strides = [1, 1]} : vector<8x128xf32> to vector<8x32xf32>
    %19 = vector.extract_strided_slice %16 {offsets = [0, 64], sizes = [8, 32], strides = [1, 1]} : vector<8x128xf32> to vector<8x32xf32>
    %20 = vector.extract_strided_slice %15 {offsets = [0, 96], sizes = [8, 32], strides = [1, 1]} : vector<8x128xf32> to vector<8x32xf32>
    %21 = arith.mulf %18, %4 : vector<8x32xf32>
    %22 = arith.mulf %17, %19 : vector<8x32xf32>
    %23 = arith.addf %21, %22 : vector<8x32xf32>
    %24 = math.tanh %23 : vector<8x32xf32>
    %25 = arith.mulf %20, %24 : vector<8x32xf32>
    %c1 = arith.constant 1 : index
    %c0_12 = arith.constant 0 : index
    %c0_13 = arith.constant 0 : index
    %26 = vector.load %arg1[%c1, %c0_12, %c0_13] : memref<2x8x32xf32, #tpu.memory_space<vmem>>, vector<1x8x32xf32>
    %27 = vector.shape_cast %26 : vector<1x8x32xf32> to vector<8x32xf32>
    %c1_14 = arith.constant 1 : index
    %c0_15 = arith.constant 0 : index
    %c0_16 = arith.constant 0 : index
    %28 = vector.load %arg2[%c1_14, %c0_15, %c0_16] : memref<2x8x32xf32, #tpu.memory_space<vmem>>, vector<1x8x32xf32>
    %29 = vector.shape_cast %28 : vector<1x8x32xf32> to vector<8x32xf32>
    %30 = tpu.concatenate %25, %27 in 1 : vector<8x32xf32>, vector<8x32xf32> -> vector<8x64xf32>
    %c0_17 = arith.constant 0 : index
    %c0_18 = arith.constant 0 : index
    %31 = vector.load %arg5[%c0_17, %c0_18] : memref<64x128xf32, #tpu.memory_space<vmem>>, vector<64x128xf32>
    %cst_19 = arith.constant dense<0.000000e+00> : vector<8x128xf32>
    %32 = tpu.matmul %30, %31, %cst_19 {dimension_numbers = #tpu.dot_dimension_numbers<[1], [0], [0], [1], [0, 0, 1, 1], [], []>} : vector<8x64xf32>, vector<64x128xf32>, vector<8x128xf32> -> vector<8x128xf32>
    %c0_20 = arith.constant 0 : index
    %c0_21 = arith.constant 0 : index
    %33 = vector.load %arg6[%c0_20, %c0_21] : memref<1x128xf32, #tpu.memory_space<vmem>>, vector<1x128xf32>
    %34 = vector.broadcast %33 : vector<1x128xf32> to vector<8x128xf32>
    %35 = arith.addf %32, %34 : vector<8x128xf32>
    %36 = arith.negf %35 : vector<8x128xf32>
    %37 = math.exp %36 : vector<8x128xf32>
    %cst_22 = arith.constant 1.000000e+00 : f32
    %38 = vector.broadcast %cst_22 : f32 to vector<8x128xf32>
    %39 = arith.addf %38, %37 : vector<8x128xf32>
    %40 = arith.divf %38, %39 : vector<8x128xf32>
    %41 = math.tanh %35 : vector<8x128xf32>
    %42 = vector.extract_strided_slice %40 {offsets = [0, 0], sizes = [8, 32], strides = [1, 1]} : vector<8x128xf32> to vector<8x32xf32>
    %43 = vector.extract_strided_slice %40 {offsets = [0, 32], sizes = [8, 32], strides = [1, 1]} : vector<8x128xf32> to vector<8x32xf32>
    %44 = vector.extract_strided_slice %41 {offsets = [0, 64], sizes = [8, 32], strides = [1, 1]} : vector<8x128xf32> to vector<8x32xf32>
    %45 = vector.extract_strided_slice %40 {offsets = [0, 96], sizes = [8, 32], strides = [1, 1]} : vector<8x128xf32> to vector<8x32xf32>
    %46 = arith.mulf %43, %29 : vector<8x32xf32>
    %47 = arith.mulf %42, %44 : vector<8x32xf32>
    %48 = arith.addf %46, %47 : vector<8x32xf32>
    %49 = math.tanh %48 : vector<8x32xf32>
    %50 = arith.mulf %45, %49 : vector<8x32xf32>
    %51 = tpu.concatenate %25, %50, %23, %48 in 1 : vector<8x32xf32>, vector<8x32xf32>, vector<8x32xf32>, vector<8x32xf32> -> vector<8x128xf32>
    %c0_23 = arith.constant 0 : index
    %c0_24 = arith.constant 0 : index
    %52 = vector.load %arg12[%c0_23, %c0_24] : memref<8x128xf32, #tpu.memory_space<vmem>>, vector<8x128xf32>
    tpu.vector_store %arg12[%c0_23, %c0_24], %51 {strides = array<i32>} : memref<8x128xf32, #tpu.memory_space<vmem>>, vector<8x128xf32>,
    %c0_25 = arith.constant 0 : index
    %c0_26 = arith.constant 0 : index
    %53 = vector.load %arg7[%c0_25, %c0_26] : memref<32x32xf32, #tpu.memory_space<vmem>>, vector<32x32xf32>
    %cst_27 = arith.constant dense<0.000000e+00> : vector<8x32xf32>
    %54 = tpu.matmul %50, %53, %cst_27 {dimension_numbers = #tpu.dot_dimension_numbers<[1], [0], [0], [1], [0, 0, 1, 1], [], []>} : vector<8x32xf32>, vector<32x32xf32>, vector<8x32xf32> -> vector<8x32xf32>
    %c0_28 = arith.constant 0 : index
    %c0_29 = arith.constant 0 : index
    %55 = vector.load %arg8[%c0_28, %c0_29] : memref<1x32xf32, #tpu.memory_space<vmem>>, vector<1x32xf32>
    %56 = vector.broadcast %55 : vector<1x32xf32> to vector<8x32xf32>
    %57 = arith.addf %54, %56 : vector<8x32xf32>
    %cst_30 = arith.constant 0.000000e+00 : f32
    %58 = vector.broadcast %cst_30 : f32 to vector<8x32xf32>
    %59 = arith.maximumf %57, %58 : vector<8x32xf32>
    %c0_31 = arith.constant 0 : index
    %c0_32 = arith.constant 0 : index
    %60 = vector.load %arg9[%c0_31, %c0_32] : memref<32x128xf32, #tpu.memory_space<vmem>>, vector<32x128xf32>
    %cst_33 = arith.constant dense<0.000000e+00> : vector<8x128xf32>
    %61 = tpu.matmul %59, %60, %cst_33 {dimension_numbers = #tpu.dot_dimension_numbers<[1], [0], [0], [1], [0, 0, 1, 1], [], []>} : vector<8x32xf32>, vector<32x128xf32>, vector<8x128xf32> -> vector<8x128xf32>
    %c0_34 = arith.constant 0 : index
    %c0_35 = arith.constant 0 : index
    %62 = vector.load %arg10[%c0_34, %c0_35] : memref<1x128xf32, #tpu.memory_space<vmem>>, vector<1x128xf32>
    %63 = vector.broadcast %62 : vector<1x128xf32> to vector<8x128xf32>
    %64 = arith.addf %61, %63 : vector<8x128xf32>
    %c0_36 = arith.constant 0 : index
    %c0_37 = arith.constant 0 : index
    %65 = vector.load %arg11[%c0_36, %c0_37] : memref<8x128xf32, #tpu.memory_space<vmem>>, vector<8x128xf32>
    tpu.vector_store %arg11[%c0_36, %c0_37], %64 {strides = array<i32>} : memref<8x128xf32, #tpu.memory_space<vmem>>, vector<8x128xf32>,
    return
  }
}

</mosaic_0001>

<bundles_post_ra>
// kernel: tpu_custom_call.1
= control target key start
LH: loop header
LB: loop body
LE: loop exit
PB: predicated region body
PF: predicated region fallthrough
CT: control target
= control target key end

     0   :  { %18 = vsyncpa [#allocation3], 0  ;;  %s1245_s0 = inlined_call_operand.hbm [shape: f32[8,16], index: 0, kind: input, shape index: {}]   ;;  %s1246_s1 = inlined_call_operand.hbm [shape: f32[2,8,32], index: 1, kind: input, shape index: {}]   ;;  %s1247_s2 = inlined_call_operand.hbm [shape: f32[2,8,32], index: 2, kind: input, shape index: {}]   ;;  %s1248_s3 = inlined_call_operand.hbm [shape: f32[48,128], index: 3, kind: input, shape index: {}]   ;;  %s1249_s4 = inlined_call_operand.vmem [shape: f32[1,128], index: 4, kind: input, shape index: {}]   ;;  %s1250_s5 = inlined_call_operand.hbm [shape: f32[64,128], index: 5, kind: input, shape index: {}]   ;;  %s1251_s6 = inlined_call_operand.vmem [shape: f32[1,128], index: 6, kind: input, shape index: {}]   ;;  %s1252_s7 = inlined_call_operand.hbm [shape: f32[32,32], index: 7, kind: input, shape index: {}]   ;;  %s1253_s8 = inlined_call_operand.hbm [shape: f32[1,32], index: 8, kind: input, shape index: {}]   ;;  %s1254_s9 = inlined_call_operand.vmem [shape: f32[32,128], index: 9, kind: input, shape index: {}]   ;;  %s1255_s10 = inlined_call_operand.vmem [shape: f32[1,128], index: 10, kind: input, shape index: {}]   ;;  %s1256_s11 = inlined_call_operand.hbm [shape: f32[8,128], index: 11, kind: output, shape index: {0}]   ;;  %s1257_s12 = inlined_call_operand.hbm [shape: f32[8,128], index: 12, kind: output, shape index: {1}]  }
   0x1   :  { %19 = vsyncpa [#allocation6], 0 }
   0x2   :  { %20 = vsyncpa [#allocation9], 0 }
   0x3   :  { %21 = vsyncpa [#allocation12], 0 }
   0x4   :  { %22 = vsyncpa [#allocation4], 0 }
   0x5   :  { %23 = vsyncpa [#allocation16], 0  ;;  %s976_s21 = smov [#allocation5]   ;;  %s766_s25 = scalar_lea.hbm %s1246_s1, 256 }
   0x6   :  { %s39_s22 = sshll.u32 %s976_s21, 4  ;;  %p767_p0 = scmp.ne.s32.totalorder %s1246_s1, %s766_s25  ;;  %s40_s22 = int_to_ptr.vmem [resolvable:$true] %s39_s22 }
   0x7   :  { %p770_p1 = scmp.lt.u32.totalorder %s766_s25, %s1246_s1 }
   0x9   :  { %p772_p2 = pnand %p770_p1, %p767_p0 }
   0xb   :  { %775 = shalt.err (!%p772_p2)
}
   0xc   :  { %s776_s30 = scalar_lea.vmem %s40_s22, 256  ;;  %p781_p4 = scmp.lt.s32.totalorder %s40_s22, %s40_s22 }
   0xd   :  { %p777_p3 = scmp.ne.s32.totalorder %s40_s22, %s776_s30  ;;  %p782_p5 = scmp.lt.s32.totalorder %s776_s30, %s776_s30 }
   0xf   :  { %p783_p6 = por %p782_p5, %p781_p4 }
  0x11   :  { %p784_p7 = pnand %p783_p6, %p777_p3 }
  0x13   :  { %787 = shalt.err (!%p784_p7)
}
  0x14   :  { %s977_s13 = smov 128   ;;  %s978_s14 = smov 8  }
  0x15   :  { %45 = dma.hbm_to_vmem [thread:$0]  %s1246_s1, 256, %s40_s22, [#allocation6], %s977_s13, %s977_s13, %s978_s14  }
  0x16   :  { %s979_s17 = smov [#allocation8]   ;;  %s980_s19 = smov [#allocation11]  }
  0x17   :  { %s63_s18 = sshll.u32 %s979_s17, 4  ;;  %s91_s20 = sshll.u32 %s980_s19, 4  ;;  %s64_s18 = int_to_ptr.vmem [resolvable:$true] %s63_s18  ;;  %s92_s20 = int_to_ptr.vmem [resolvable:$true] %s91_s20 }
  0x18   :  { %s788_s24 = scalar_lea.hbm %s1248_s3, 768 }
  0x19   :  { %p789_p8 = scmp.ne.s32.totalorder %s1248_s3, %s788_s24  ;;  %p792_p9 = scmp.lt.u32.totalorder %s788_s24, %s1248_s3 }
  0x1b   :  { %p794_p10 = pnand %p792_p9, %p789_p8 }
  0x1d   :  { %797 = shalt.err (!%p794_p10)
}
  0x1e   :  { %s798_s1 = scalar_lea.vmem %s64_s18, 768  ;;  %p803_p12 = scmp.lt.s32.totalorder %s64_s18, %s64_s18 }
  0x1f   :  { %p799_p11 = scmp.ne.s32.totalorder %s64_s18, %s798_s1  ;;  %p804_p13 = scmp.lt.s32.totalorder %s798_s1, %s798_s1 }
  0x21   :  { %p805_p0 = por %p804_p13, %p803_p12 }
  0x23   :  { %p806_p1 = pnand %p805_p0, %p799_p11 }
  0x25   :  { %809 = shalt.err (!%p806_p1)
}
  0x26   :  { %69 = dma.hbm_to_vmem [thread:$0]  %s1248_s3, 768, %s64_s18, [#allocation9], %s977_s13, %s977_s13, %s978_s14  }
  0x27   :  { %s810_s16 = scalar_lea.hbm %s1252_s7, 512 }
  0x28   :  { %p811_p2 = scmp.ne.s32.totalorder %s1252_s7, %s810_s16  ;;  %p814_p3 = scmp.lt.u32.totalorder %s810_s16, %s1252_s7 }
  0x2a   :  { %p816_p4 = pnand %p814_p3, %p811_p2 }
  0x2c   :  { %819 = shalt.err (!%p816_p4)
}
  0x2d   :  { %s820_s24 = scalar_lea.vmem %s92_s20, 512  ;;  %p825_p6 = scmp.lt.s32.totalorder %s92_s20, %s92_s20 }
  0x2e   :  { %p821_p5 = scmp.ne.s32.totalorder %s92_s20, %s820_s24  ;;  %p826_p7 = scmp.lt.s32.totalorder %s820_s24, %s820_s24 }
  0x30   :  { %p827_p8 = por %p826_p7, %p825_p6 }
  0x32   :  { %p828_p9 = pnand %p827_p8, %p821_p5 }
  0x34   :  { %831 = shalt.err (!%p828_p9)
}
  0x35   :  { %97 = dma.hbm_to_vmem [thread:$0]  %s1252_s7, 512, %s92_s20, [#allocation12], %s977_s13, %s977_s13, %s978_s14  }
  0x36   :  { %s981_s25 = smov [#allocation2]   ;;  %s982_s27 = smov [#allocation7]  }
  0x37   :  { %s30_s26 = sshll.u32 %s981_s25, 4  ;;  %s51_s28 = sshll.u32 %s982_s27, 4  ;;  %s31_s26 = int_to_ptr.vmem [resolvable:$true] %s30_s26  ;;  %s52_s28 = int_to_ptr.vmem [resolvable:$true] %s51_s28 }
  0x38   :  { %s832_s29 = scalar_lea.hbm %s1245_s0, 128 }
  0x39   :  { %p833_p10 = scmp.ne.s32.totalorder %s1245_s0, %s832_s29  ;;  %p836_p11 = scmp.lt.u32.totalorder %s832_s29, %s1245_s0 }
  0x3b   :  { %p838_p12 = pnand %p836_p11, %p833_p10 }
  0x3d   :  { %841 = shalt.err (!%p838_p12)
}
  0x3e   :  { %s842_s7 = scalar_lea.vmem %s31_s26, 128  ;;  %p847_p0 = scmp.lt.s32.totalorder %s31_s26, %s31_s26 }
  0x3f   :  { %p843_p13 = scmp.ne.s32.totalorder %s31_s26, %s842_s7  ;;  %p848_p1 = scmp.lt.s32.totalorder %s842_s7, %s842_s7 }
  0x41   :  { %p849_p2 = por %p848_p1, %p847_p0 }
  0x43   :  { %p850_p3 = pnand %p849_p2, %p843_p13 }
  0x45   :  { %853 = shalt.err (!%p850_p3)
}
  0x46   :  { %33 = dma.hbm_to_vmem [thread:$0]  %s1245_s0, 128, %s31_s26, [#allocation3]  }
  0x47   :  { %s854_s24 = scalar_lea.hbm %s1247_s2, 256 }
  0x48   :  { %p855_p4 = scmp.ne.s32.totalorder %s1247_s2, %s854_s24  ;;  %p858_p5 = scmp.lt.u32.totalorder %s854_s24, %s1247_s2 }
  0x4a   :  { %p860_p6 = pnand %p858_p5, %p855_p4 }
  0x4c   :  { %863 = shalt.err (!%p860_p6)
}
  0x4d   :  { %s864_s1 = scalar_lea.vmem %s52_s28, 256  ;;  %p869_p8 = scmp.lt.s32.totalorder %s52_s28, %s52_s28 }
  0x4e   :  { %p865_p7 = scmp.ne.s32.totalorder %s52_s28, %s864_s1  ;;  %p870_p9 = scmp.lt.s32.totalorder %s864_s1, %s864_s1 }
  0x50   :  { %p871_p10 = por %p870_p9, %p869_p8 }
  0x52   :  { %p872_p11 = pnand %p871_p10, %p865_p7 }
  0x54   :  { %875 = shalt.err (!%p872_p11)
}
  0x55   :  { %57 = dma.hbm_to_vmem [thread:$0]  %s1247_s2, 256, %s52_s28, [#allocation6], %s977_s13, %s977_s13, %s978_s14  }
  0x56   :  { %s983_s22 = smov [#allocation10]   ;;  %s984_s30 = smov [#allocation13]  }
  0x57   :  { %s77_s29 = sshll.u32 %s983_s22, 4  ;;  %s104_s15 = sshll.u32 %s984_s30, 4  ;;  %s78_s29 = int_to_ptr.vmem [resolvable:$true] %s77_s29  ;;  %s105_s15 = int_to_ptr.vmem [resolvable:$true] %s104_s15 }
  0x58   :  { %s876_s7 = scalar_lea.hbm %s1250_s5, 1024 }
  0x59   :  { %p877_p12 = scmp.ne.s32.totalorder %s1250_s5, %s876_s7  ;;  %p880_p13 = scmp.lt.u32.totalorder %s876_s7, %s1250_s5 }
  0x5b   :  { %p882_p0 = pnand %p880_p13, %p877_p12 }
  0x5d   :  { %885 = shalt.err (!%p882_p0)
}
  0x5e   :  { %s886_s2 = scalar_lea.vmem %s78_s29, 1024  ;;  %p891_p2 = scmp.lt.s32.totalorder %s78_s29, %s78_s29 }
  0x5f   :  { %p887_p1 = scmp.ne.s32.totalorder %s78_s29, %s886_s2  ;;  %p892_p3 = scmp.lt.s32.totalorder %s886_s2, %s886_s2 }
  0x61   :  { %p893_p4 = por %p892_p3, %p891_p2 }
  0x63   :  { %p894_p5 = pnand %p893_p4, %p887_p1 }
  0x65   :  { %897 = shalt.err (!%p894_p5)
}
  0x66   :  { %83 = dma.hbm_to_vmem [thread:$0]  %s1250_s5, 1024, %s78_s29, [#allocation9], %s977_s13, %s977_s13, %s978_s14  }
  0x67   :  { %s898_s25 = scalar_lea.hbm %s1253_s8, 16 }
  0x68   :  { %p899_p6 = scmp.ne.s32.totalorder %s1253_s8, %s898_s25  ;;  %p902_p7 = scmp.lt.u32.totalorder %s898_s25, %s1253_s8 }
  0x6a   :  { %p904_p8 = pnand %p902_p7, %p899_p6 }
  0x6c   :  { %907 = shalt.err (!%p904_p8)
}
  0x6d   :  { %s908_s22 = scalar_lea.vmem %s105_s15, 16  ;;  %s912_s30 = scalar_lea.vmem %s105_s15, 32 }
  0x6e   :  { %p909_p9 = scmp.ne.s32.totalorder %s105_s15, %s908_s22  ;;  %p913_p10 = scmp.lt.s32.totalorder %s105_s15, %s105_s15 }
  0x6f   :  { %p914_p11 = scmp.lt.s32.totalorder %s912_s30, %s908_s22 }
  0x71   :  { %p915_p12 = por %p914_p11, %p913_p10 }
  0x73   :  { %p916_p13 = pnand %p915_p12, %p909_p9 }
  0x75   :  { %919 = shalt.err (!%p916_p13)
}
  0x76   :  { %107 = dma.hbm_to_vmem [thread:$0]  %s1253_s8, 16, %s105_s15, [#allocation12]  }
  0x77   :  { %964 = dma.done.wait [#allocation3], 128  }
  0x78   :  { %965 = vsyncadd [#allocation3], 4294967168 }
  0x79   :  { %966 = dma.done.wait [#allocation6], 512  }
  0x7a   :  { %967 = vsyncadd [#allocation6], 4294966784 }
  0x7b   :  { %968 = dma.done.wait [#allocation9], 1792  }
  0x7c   :  { %969 = vsyncadd [#allocation9], 4294965504 }
  0x7d   :  { %970 = dma.done.wait [#allocation12], 528  }
  0x7e   :  { %971 = vsyncadd [#allocation12], 4294966768  ;;  %v985_v0 = vmov 0.0|0.0   ;;  %vm986_vm0 = vmmov 0   ;;  %v987_v1 = vmov 0.0   ;;  %v134_v2 = vld [vmem:[#allocation5] sm:$0xff] }
  0x7f   :  { %700 = vmatprep.subr.bf16.mxu0 %v985_v0  ;;  %709 = vmatprep.subr.bf16.mxu1 %v985_v0  ;;  %v142_v3 = vld [vmem:[#allocation8] sm:$0xff]  ;;  %v143_v4 = vld [vmem:[#allocation8 + $0x8] sm:$0xff]  ;;  %s988_s8 = smov 16   ;;  %v144_v6 = vld [vmem:[#allocation8 + $0x10] sm:$0xff]  ;;  %s989_s14 = smov 32   ;;  %vm140_vm1 = vcmask 130048  }
  0x80   :  { %656 = vmatprep.mubr.msk.f32.mxu0 %vm986_vm0, %v987_v1  ;;  %675 = vmatprep.mubr.msk.f32.mxu1 %vm986_vm0, %v987_v1  ;;  %v701_v5 = vpack.c.bf16 %v143_v4, %v142_v3  ;;  %v145_v7 = vld [vmem:[#allocation8 + $0x18] sm:$0xff]  ;;  %v135_v8 = vld [vmem:[#allocation7] sm:$0xff]  ;;  %v146_v10 = vld [vmem:[#allocation8 + $0x20] sm:$0xff]  ;;  %vm155_vm2 = vcmask 392192   ;;  %s990_s16 = smov 64   ;;  %vm269_vm3 = vcmask 261120  }
  0x81   :  { %137 = vrot.lane.b32.xlu0 %v134_v2, %s988_s8  ;;  %v704_v9 = vpack.c.bf16 %v145_v7, %v144_v6  ;;  %237 = vrot.lane.b32.xlu1 %v135_v8, %s989_s14  ;;  %v147_v11 = vld [vmem:[#allocation8 + $0x28] sm:$0xff]  ;;  %v133_v13 = vld [vmem:[#allocation2] sm:$0xff]  ;;  %v271_v31 = vld [vmem:[#allocation10] sm:$0xff]  ;;  %vm286_vm4 = vcmask 523264   ;;  %vm402_vm5 = vcmask 785408   ;;  %s991_s24 = smov [#allocation15]  }
  0x82   :  { %702 = vmatpush3.bf16.msra.mxu0 %v701_v5  ;;  %v707_v12 = vpack.c.bf16 %v147_v11, %v146_v10  ;;  %v608_v16 = vld [vmem:[%s1249_s4] ss:$0 sm:$0xff]  ;;  %v273_v33 = vld [vmem:[#allocation10 + $0x10] sm:$0xff]  ;;  %v274_v35 = vld [vmem:[#allocation10 + $0x18] sm:$0xff]  ;;  %s592_s3 = sshll.u32 %s991_s24, 4  ;;  %s593_s3 = int_to_ptr.vmem [resolvable:$true] %s592_s3 }
  0x83   :  { %703 = vmatprep.subr.bf16.mxu0 %v985_v0  ;;  %v272_v32 = vld [vmem:[#allocation10 + $0x8] sm:$0xff]  ;;  %v713_v36 = vpack.c.bf16 %v274_v35, %v273_v33  ;;  %v275_v37 = vld [vmem:[#allocation10 + $0x20] sm:$0xff]  ;;  %v277_v40 = vld [vmem:[#allocation10 + $0x30] sm:$0xff]  ;;  %s920_s18 = scalar_lea.vmem %s593_s3, 128  ;;  %p925_p1 = scmp.lt.s32.totalorder %s593_s3, %s593_s3 }
  0x84   :  { %v710_v34 = vpack.c.bf16 %v272_v32, %v271_v31  ;;  %v276_v38 = vld [vmem:[#allocation10 + $0x28] sm:$0xff]  ;;  %v278_v41 = vld [vmem:[#allocation10 + $0x38] sm:$0xff]  ;;  %v405_v3 = vld [vmem:[#allocation11] sm:$0xff]  ;;  %p921_p0 = scmp.ne.s32.totalorder %s593_s3, %s920_s18  ;;  %p926_p2 = scmp.lt.s32.totalorder %s920_s18, %s920_s18 }
  0x85   :  { %v716_v39 = vpack.c.bf16 %v276_v38, %v275_v37  ;;  %v719_v43 = vpack.c.bf16 %v278_v41, %v277_v40  ;;  %v258_v44 = vld [vmem:[#allocation5 + $0x8] sm:$0xff]  ;;  %v260_v45 = vld [vmem:[#allocation7 + $0x8] sm:$0xff]  ;;  %v407_v5 = vld [vmem:[#allocation11 + $0x10] sm:$0xff] }
  0x86   :  { %705 = vmatpush3.bf16.msra.mxu0 %v704_v9  ;;  %711 = vmatpush3.bf16.msra.mxu1 %v710_v34  ;;  %v611_v51 = vld [vmem:[%s1251_s6] ss:$0 sm:$0xff]  ;;  %v408_v7 = vld [vmem:[#allocation11 + $0x18] sm:$0xff]  ;;  %v492_v11 = vld [vmem:[%s1254_s9 + $0x8] sm:$0xff]  ;;  %p927_p3 = por %p926_p2, %p925_p1 }
  0x87   :  { %706 = vmatprep.subr.bf16.mxu0 %v985_v0  ;;  %712 = vmatprep.subr.bf16.mxu1 %v985_v0  ;;  %v406_v4 = vld [vmem:[#allocation11 + $0x8] sm:$0xff]  ;;  %v725_v8 = vpack.c.bf16 %v408_v7, %v407_v5 }
  0x88   :  { %v722_v6 = vpack.c.bf16 %v406_v4, %v405_v3  ;;  %v491_v10 = vld [vmem:[%s1254_s9] sm:$0xff]  ;;  %p928_p4 = pnand %p927_p3, %p921_p0 }
  0x8a   :  { %708 = vmatpush3.bf16.msra.mxu0 %v707_v12  ;;  %714 = vmatpush3.bf16.msra.mxu1 %v713_v36  ;;  %v728_v12 = vpack.c.bf16 %v492_v11, %v491_v10 }
  0x8b   :  { %721 = vmatprep.subr.bf16.mxu0 %v985_v0  ;;  %715 = vmatprep.subr.bf16.mxu1 %v985_v0 }
  0x8e   :  { %717 = vmatpush3.bf16.msra.mxu1 %v716_v39 }
  0x8f   :  { %718 = vmatprep.subr.bf16.mxu1 %v985_v0 }
  0x92   :  { %720 = vmatpush3.bf16.msra.mxu1 %v719_v43 }
  0x93   :  { %727 = vmatprep.subr.bf16.mxu1 %v985_v0 }
  0xf3   :  { %v138_v14 = vpop.permute.xlu0 %137  ;;  %v238_v27 = vpop.permute.xlu1 %237 }
  0xf4   :  { %v141_v15 = vsel %vm140_vm1, %v133_v13, %v138_v14 }
  0xf5   :  { %657 = vmatmul.mubr.msk.f32.vlgmr.msra.gmra.mrb[0].mxu0 %vm155_vm2, %v141_v15 }
  0xf6   :  { %686 = vmatprep.mubr.msk.f32.mxu0 %vm986_vm0, %v987_v1  ;;  %723 = vmatpush3.bf16.msra.mxu0 %v722_v6 }
  0xf7   :  { %724 = vmatprep.subr.bf16.mxu0 %v985_v0 }
  0xfa   :  { %726 = vmatpush3.bf16.msra.mxu0 %v725_v8 }
 0x1c8   :  { %v225_v17 = vpop.f32.mrb[0].mxu0 }
 0x1c9   :  { %v226_v18 = vadd.f32 %v608_v16, %v225_v17  ;;  %v658_v19 = vpop.f32.mrb[1].mxu0 }
 0x1cb   :  { %750 = vtanh.f32 %v226_v18  ;;  %v610_v21 = vmul.f32 -1.442695, %v226_v18 }
 0x1cd   :  { %752 = vpow2.f32 %v610_v21  ;;  %v493_v21 = vld [vmem:[%s1254_s9 + $0x10] sm:$0xff] }
 0x1d5   :  { %v751_v20 = vpop.eup %750 }
 0x1d6   :  { %242 = vrot.lane.b32.xlu0 %v751_v20, %s990_s16 }
 0x1d7   :  { %v753_v22 = vpop.eup %752 }
 0x1d8   :  { %v232_v23 = vadd.f32 1.0, %v753_v22  ;;  %v494_v22 = vld [vmem:[%s1254_s9 + $0x18] sm:$0xff] }
 0x1da   :  { %754 = vrcp.f32 %v232_v23  ;;  %v731_v23 = vpack.c.bf16 %v494_v22, %v493_v21 }
 0x1e4   :  { %v755_v24 = vpop.eup %754 }
 0x1e5   :  { %v240_v28 = vmul.f32 %v755_v24, %v238_v27 }
 0x248   :  { %v243_v25 = vpop.permute.xlu0 %242 }
 0x249   :  { %v245_v26 = vmul.f32 %v755_v24, %v243_v25 }
 0x24b   :  { %247 = vrot.lane.b32.xlu1 %v245_v26, %s989_s14 }
 0x2bd   :  { %v248_v29 = vpop.permute.xlu1 %247 }
 0x2be   :  { %v1174_v30 = vadd.f32 %v248_v29, %v240_v28 }
 0x2c0   :  { %756 = vtanh.f32 %v1174_v30 }
 0x2ca   :  { %v757_v42 = vpop.eup %756 }
 0x2cb   :  { %253 = vrot.lane.b32.xlu0 %v757_v42, %s990_s16 }
 0x2cf   :  { %266 = vrot.lane.b32.xlu0 %v258_v44, %s989_s14 }
 0x2d3   :  { %368 = vrot.lane.b32.xlu0 %v260_v45, %s989_s14 }
 0x33d   :  { %v254_v46 = vpop.permute.xlu0 %253 }
 0x33e   :  { %v256_v47 = vmul.f32 %v755_v24, %v254_v46  ;;  %v614_v24 = vld [vmem:[#allocation13] ss:$0 sm:$0xff] }
 0x340   :  { %262 = vrot.lane.b32.xlu1 %v256_v47, %s989_s14 }
 0x341   :  { %v267_v48 = vpop.permute.xlu0 %266 }
 0x345   :  { %v369_v62 = vpop.permute.xlu0 %368 }
 0x3b2   :  { %v263_v49 = vpop.permute.xlu1 %262 }
 0x3b3   :  { %v270_v50 = vsel %vm269_vm3, %v263_v49, %v267_v48 }
 0x3b4   :  { %676 = vmatmul.mubr.msk.f32.vlgmr.msra.gmra.mrb[0].mxu1 %vm286_vm4, %v270_v50 }
 0x3b5   :  { %697 = vmatprep.mubr.msk.f32.mxu1 %vm986_vm0, %v987_v1  ;;  %729 = vmatpush3.bf16.msra.mxu1 %v728_v12 }
 0x3b6   :  { %730 = vmatprep.subr.bf16.mxu1 %v985_v0 }
 0x3b9   :  { %732 = vmatpush3.bf16.msra.mxu1 %v731_v23 }
 0x487   :  { %v356_v52 = vpop.f32.mrb[0].mxu1 }
 0x488   :  { %v357_v53 = vadd.f32 %v611_v51, %v356_v52  ;;  %v677_v54 = vpop.f32.mrb[1].mxu1 }
 0x48a   :  { %758 = vtanh.f32 %v357_v53  ;;  %v613_v56 = vmul.f32 -1.442695, %v357_v53 }
 0x48c   :  { %760 = vpow2.f32 %v613_v56 }
 0x494   :  { %v759_v55 = vpop.eup %758 }
 0x495   :  { %373 = vrot.lane.b32.xlu1 %v759_v55, %s990_s16 }
 0x496   :  { %v761_v57 = vpop.eup %760 }
 0x497   :  { %v363_v58 = vadd.f32 1.0, %v761_v57 }
 0x499   :  { %762 = vrcp.f32 %v363_v58 }
 0x4a3   :  { %v763_v59 = vpop.eup %762 }
 0x4a4   :  { %v371_v63 = vmul.f32 %v763_v59, %v369_v62 }
 0x507   :  { %v374_v60 = vpop.permute.xlu1 %373 }
 0x508   :  { %v376_v61 = vmul.f32 %v763_v59, %v374_v60 }
 0x50a   :  { %378 = vrot.lane.b32.xlu1 %v376_v61, %s989_s14 }
 0x57c   :  { %v379_v1 = vpop.permute.xlu1 %378 }
 0x57d   :  { %v381_v2 = vadd.f32 %v379_v1, %v371_v63 }
 0x57f   :  { %764 = vtanh.f32 %v381_v2 }
 0x589   :  { %v765_v9 = vpop.eup %764 }
 0x58a   :  { %384 = vrot.lane.b32.xlu0 %v765_v9, %s990_s16 }
 0x5fc   :  { %v385_v13 = vpop.permute.xlu0 %384 }
 0x5fd   :  { %v387_v14 = vmul.f32 %v763_v59, %v385_v13 }
 0x5ff   :  { %389 = vrot.lane.b32.xlu0 %v387_v14, %s990_s16  ;;  %416 = vrot.lane.b32.xlu1 %v387_v14, %s989_s14 }
 0x603   :  { %397 = vrot.lane.b32.xlu0 %v381_v2, %s990_s16  ;;  %393 = vrot.lane.b32.xlu1 %v1174_v30, %s989_s14 }
 0x671   :  { %v390_v15 = vpop.permute.xlu0 %389  ;;  %v417_v16 = vpop.permute.xlu1 %416 }
 0x672   :  { %687 = vmatmul.mubr.msk.f32.vlgmr.msra.gmra.mrb[2].mxu0 %vm269_vm3, %v417_v16  ;;  %v400_v17 = vsel %vm269_vm3, %v263_v49, %v390_v15 }
 0x675   :  { %v398_v18 = vpop.permute.xlu0 %397  ;;  %v394_v0 = vpop.permute.xlu1 %393 }
 0x676   :  { %v401_v19 = vsel %vm286_vm4, %v400_v17, %v394_v0 }
 0x677   :  { %v403_v20 = vsel %vm402_vm5, %v401_v19, %v398_v18 }
 0x678   :  { %404 = vst [vmem:[#allocation15] sm:$0xff] %v403_v20 }
 0x745   :  { %v486_v25 = vpop.f32.mrb[2].mxu0 }
 0x746   :  { %v487_v26 = vadd.f32 %v614_v24, %v486_v25  ;;  %v688_v27 = vpop.f32.mrb[3].mxu0 }
 0x748   :  { %v490_v28 = vmax.f32 %v487_v26, 0.0 }
 0x74a   :  { %698 = vmatmul.mubr.msk.f32.vlgmr.msra.gmra.mrb[2].mxu1 %vm269_vm3, %v490_v28 }
 0x74b   :  { %931 = shalt.err (!%p928_p4)
}
 0x74c   :  { %s932_s27 = scalar_lea.hbm %s1257_s12, 128 }
 0x74d   :  { %p933_p5 = scmp.ne.s32.totalorder %s1257_s12, %s932_s27  ;;  %p936_p6 = scmp.lt.u32.totalorder %s932_s27, %s1257_s12 }
 0x74f   :  { %p938_p7 = pnand %p936_p6, %p933_p5 }
 0x751   :  { %941 = shalt.err (!%p938_p7)
}
 0x752   :  { %595 = dma.vmem_to_hbm [thread:$0]  %s593_s3, 128, %s1257_s12, [#allocation16]   ;;  %v616_v29 = vld [vmem:[%s1255_s10] ss:$0 sm:$0xff] }
 0x753   :  { %s992_s14 = smov [#allocation14]  }
 0x754   :  { %s582_s29 = sshll.u32 %s992_s14, 4  ;;  %s583_s29 = int_to_ptr.vmem [resolvable:$true] %s582_s29 }
 0x755   :  { %s942_s15 = scalar_lea.vmem %s583_s29, 128  ;;  %p947_p9 = scmp.lt.s32.totalorder %s583_s29, %s583_s29 }
 0x756   :  { %p943_p8 = scmp.ne.s32.totalorder %s583_s29, %s942_s15  ;;  %p948_p10 = scmp.lt.s32.totalorder %s942_s15, %s942_s15 }
 0x758   :  { %p949_p11 = por %p948_p10, %p947_p9 }
 0x75a   :  { %p950_p12 = pnand %p949_p11, %p943_p8 }
 0x81d   :  { %v571_v30 = vpop.f32.mrb[2].mxu1 }
 0x81e   :  { %v572_v31 = vadd.f32 %v616_v29, %v571_v30  ;;  %v699_v32 = vpop.f32.mrb[3].mxu1 }
 0x820   :  { %575 = vst [vmem:[#allocation14] sm:$0xff] %v572_v31 }
 0x821   :  { %953 = shalt.err (!%p950_p12)
}
 0x822   :  { %s954_s4 = scalar_lea.hbm %s1256_s11, 128 }
 0x823   :  { %p955_p13 = scmp.ne.s32.totalorder %s1256_s11, %s954_s4  ;;  %p958_p0 = scmp.lt.u32.totalorder %s954_s4, %s1256_s11 }
 0x825   :  { %p960_p1 = pnand %p958_p0, %p955_p13 }
 0x827   :  { %963 = shalt.err (!%p960_p1)
}
 0x828   :  { %585 = dma.vmem_to_hbm [thread:$0]  %s583_s29, 128, %s1256_s11, [#allocation4]  }
 0x829   :  { %972 = dma.done.wait [#allocation4], 128  }
 0x82a   :  { %973 = vsyncadd [#allocation4], 4294967168 }
 0x82b   :  { %974 = dma.done.wait [#allocation16], 128  }
 0x82c   :  { %975 = vsyncadd [#allocation16], 4294967168 }
 0x82d   :  { %602 = vsyncpa [#allocation3], 1 }
 0x82e   :  { %603 = vsyncpa [#allocation6], 1 }
 0x82f   :  { %604 = vsyncpa [#allocation9], 1 }
 0x830   :  { %605 = vsyncpa [#allocation12], 1 }
 0x831   :  { %606 = vsyncpa [#allocation4], 1 }
 0x832   :  { %607 = vsyncpa [#allocation16], 1 }

</bundles_post_ra>
